<compile_context>
chip_gen: v5e
topology: v5e:2x2
jax: 0.10.0
libtpu: 0.0.40
codegen_flags: <defaults>
</compile_context>

<pallas_src>
import functools

import jax
import jax.numpy as jnp
from jax.experimental import pallas as pl
from jax.experimental.pallas import tpu as pltpu


def _round_up(v, m):
    return ((v + m - 1) // m) * m


def residual_block_kernel(a_ref, xw_ref, xi_ref, bg_ref, wl_ref, o_ref, acc_ref):
    k = pl.program_id(1)

    @pl.when(k == 0)
    def _():
        acc_ref[...] = jnp.zeros_like(acc_ref)

    # GCNConv aggregation: A_hat tile @ precomputed XW tile (bf16 MXU, f32 acc).
    acc_ref[...] += jnp.dot(a_ref[...], xw_ref[...],
                            preferred_element_type=jnp.float32)

    @pl.when(k == pl.num_programs(1) - 1)
    def _():
        h = jnp.maximum(acc_ref[...] + bg_ref[...], 0.0)      # + bias, ReLU
        h = jnp.dot(h.astype(jnp.bfloat16), wl_ref[...],
                    preferred_element_type=jnp.float32)        # Linear (no bias)
        o_ref[...] = jnp.maximum(h + xi_ref[...], 0.0)         # residual + ReLU


def _build_a_hat_padded(edge_index, num_nodes, n_pad):
    """Dense gcn_norm (add_self_loops=True) built at padded shape, cast bf16.

    Padding rows/cols only carry a self-loop (deg=1), contribute zero to real
    rows (their x rows are zero-padded) and are sliced off the output."""
    src, dst = edge_index[0], edge_index[1]
    A = jnp.zeros((n_pad, n_pad), jnp.float32).at[dst, src].add(1.0)
    A = A + jnp.eye(n_pad, dtype=jnp.float32)                  # self loops
    dinv = 1.0 / jnp.sqrt(A.sum(axis=1))
    return (A * dinv[:, None] * dinv[None, :]).astype(jnp.bfloat16)


@functools.partial(jax.jit, static_argnames=("tile",))
def residual_block(x, edge_index, w_gcn, b_gcn, w_ln, *, tile=1024):
    """x: [N, F]; edge_index: [2, E] int32 (row 0 = source, row 1 = target);
    w_gcn, w_ln: [F, F] in PyTorch layout [out, in]; b_gcn: [F]."""
    N, F = x.shape
    f_pad = _round_up(max(F, 128), 128)            # lane-dense feature dim
    t = _round_up(min(tile, N), 128)               # A-tile edge, 128-multiple
    n_pad = _round_up(N, t)
    n_i = n_pad // t
    n_k = n_pad // t

    # A_hat built padded + bf16 in one pass.
    a_p = _build_a_hat_padded(edge_index, N, n_pad)

    # Hoisted feature transform XW = X @ Wg^T, computed once in f32, cast to
    # bf16 once, zero-padded (exact: padded rows/cols contribute zero).
    xw = jnp.dot(x.astype(jnp.float32), w_gcn.T.astype(jnp.float32))
    xw_p = jnp.zeros((n_pad, f_pad), jnp.bfloat16).at[:N, :F].set(
        xw.astype(jnp.bfloat16))

    # Residual stream (kept f32 for an exact residual add), bias, Wl^T.
    xi_p = jnp.zeros((n_pad, f_pad), jnp.float32).at[:N, :F].set(
        x.astype(jnp.float32))
    bg_p = jnp.zeros((1, f_pad), jnp.float32).at[0, :F].set(
        b_gcn.astype(jnp.float32))
    wl_p = jnp.zeros((f_pad, f_pad), jnp.bfloat16).at[:F, :F].set(
        w_ln.T.astype(jnp.bfloat16))

    flops = 2 * n_pad * n_pad * f_pad + 2 * n_pad * f_pad * f_pad
    bytes_accessed = (2 * n_pad * n_pad                 # bf16 A_hat (dominant)
                      + 2 * n_i * n_pad * f_pad         # bf16 XW, re-read n_i x
                      + 4 * n_pad * f_pad               # f32 residual x
                      + 4 * n_pad * f_pad               # f32 output
                      + 2 * f_pad * f_pad + 4 * f_pad)  # Wl^T + bias

    out_p = pl.pallas_call(
        residual_block_kernel,
        out_shape=jax.ShapeDtypeStruct((n_pad, f_pad), jnp.float32),
        grid=(n_i, n_k),
        in_specs=[
            pl.BlockSpec((t, t), lambda i, k: (i, k)),          # A_hat tile
            pl.BlockSpec((t, f_pad), lambda i, k: (k, 0)),      # bf16 XW tile
            pl.BlockSpec((t, f_pad), lambda i, k: (i, 0)),      # residual rows
            pl.BlockSpec((1, f_pad), lambda i, k: (0, 0)),      # bias resident
            pl.BlockSpec((f_pad, f_pad), lambda i, k: (0, 0)),  # Wl^T resident
        ],
        out_specs=pl.BlockSpec((t, f_pad), lambda i, k: (i, 0)),
        scratch_shapes=[pltpu.VMEM((t, f_pad), jnp.float32)],   # f32 accumulator
        compiler_params=pltpu.CompilerParams(
            dimension_semantics=("parallel", "arbitrary"),
            vmem_limit_bytes=48 * 1024 * 1024),
        cost_estimate=pl.CostEstimate(flops=int(flops), transcendentals=0,
                                      bytes_accessed=int(bytes_accessed)),
    )(a_p, xw_p, xi_p, bg_p, wl_p)

    return out_p[:N, :F]


def build_normalized_adjacency(edge_index, num_nodes):
    """Unpadded f32 A_hat (reference path only)."""
    src, dst = edge_index[0], edge_index[1]
    A = jnp.zeros((num_nodes, num_nodes), jnp.float32).at[dst, src].add(1.0)
    A = A + jnp.eye(num_nodes, dtype=jnp.float32)
    dinv = 1.0 / jnp.sqrt(A.sum(axis=1))
    return A * dinv[:, None] * dinv[None, :]


def reference(a_hat, x, w_gcn, b_gcn, w_ln):
    h = a_hat @ (x @ w_gcn.T) + b_gcn[None, :]
    h = jnp.maximum(h, 0.0)
    h = h @ w_ln.T
    return jnp.maximum(h + x, 0.0)


if __name__ == "__main__":
    N = 8          # number of graph nodes
    F = 32         # outfeature
    E = 16         # number of directed edges

    key = jax.random.PRNGKey(0)
    k_x, k_src, k_dst, k_wg, k_bg, k_wl = jax.random.split(key, 6)

    # Node features.
    x = jax.random.normal(k_x, (N, F), dtype=jnp.float32)

    # Deterministic edge_index [2, E] (no explicit self loops; GCN adds them).
    src = jax.random.randint(k_src, (E,), 0, N)
    dst = (src + 1 + jax.random.randint(k_dst, (E,), 0, N - 1)) % N
    edge_index = jnp.stack([src, dst], axis=0).astype(jnp.int32)

    # Parameters (PyTorch layout: weight is [out_features, in_features]).
    w_gcn = jax.random.normal(k_wg, (F, F), dtype=jnp.float32) * 0.1
    b_gcn = jax.random.normal(k_bg, (F,), dtype=jnp.float32) * 0.1
    w_ln = jax.random.normal(k_wl, (F, F), dtype=jnp.float32) * 0.1

    out = jax.block_until_ready(residual_block(x, edge_index, w_gcn, b_gcn, w_ln))

    a_hat = build_normalized_adjacency(edge_index, N)
    ref = reference(a_hat, x, w_gcn, b_gcn, w_ln)

    assert out.shape == (N, F)
    # bf16 matmul operands with f32 accumulation -> ~1e-2 relative error budget.
    err = float(jnp.max(jnp.abs(out - ref)))
    assert jnp.allclose(out, ref, atol=5e-2, rtol=5e-2), f"mismatch, max|d|={err}"

    print("KERNEL_OK")
</pallas_src>

<mosaic_0001>
module attributes {stable_mosaic.version = 11 : i64} {
  func.func @residual_block_kernel(%arg0: i32, %arg1: i32, %arg2: memref<128x128xbf16, #tpu.memory_space<vmem>>, %arg3: memref<128x128xbf16, #tpu.memory_space<vmem>>, %arg4: memref<128x128xf32, #tpu.memory_space<vmem>>, %arg5: memref<1x128xf32, #tpu.memory_space<vmem>>, %arg6: memref<128x128xbf16, #tpu.memory_space<vmem>>, %arg7: memref<128x128xf32, #tpu.memory_space<vmem>>, %arg8: memref<128x128xf32, #tpu.memory_space<vmem>>) attributes {dimension_semantics = [#tpu.dimension_semantics<parallel>, #tpu.dimension_semantics<arbitrary>], iteration_bounds = array<i64: 1, 1>, scalar_prefetch = 0 : i64, scratch_operands = 1 : i64, tpu.core_type = #tpu.core_type<tc>, window_params = [{transform_indices = @transform_0, window_bounds = array<i64: 128, 128>}, {transform_indices = @transform_1, window_bounds = array<i64: 128, 128>}, {transform_indices = @transform_2, window_bounds = array<i64: 128, 128>}, {pipeline_mode = #tpu.pipeline_mode<synchronous>, transform_indices = @transform_3, window_bounds = array<i64: 1, 128>}, {pipeline_mode = #tpu.pipeline_mode<synchronous>, transform_indices = @transform_4, window_bounds = array<i64: 128, 128>}, {transform_indices = @transform_5, window_bounds = array<i64: 128, 128>}]} {
    %c0_i32 = arith.constant 0 : i32
    %0 = arith.cmpi eq, %arg1, %c0_i32 : i32
    %1 = arith.extui %0 : i1 to i32
    %c0_i32_0 = arith.constant 0 : i32
    %2 = arith.cmpi ne, %1, %c0_i32_0 : i32
    scf.if %2 {
      %cst_10 = arith.constant 0.000000e+00 : f32
      %12 = vector.broadcast %cst_10 : f32 to vector<128x128xf32>
      %c0_11 = arith.constant 0 : index
      %c0_12 = arith.constant 0 : index
      %13 = vector.load %arg8[%c0_11, %c0_12] : memref<128x128xf32, #tpu.memory_space<vmem>>, vector<128x128xf32>
      tpu.vector_store %arg8[%c0_11, %c0_12], %12 {strides = array<i32>} : memref<128x128xf32, #tpu.memory_space<vmem>>, vector<128x128xf32>,
    } else {
    }
    %c0 = arith.constant 0 : index
    %c0_1 = arith.constant 0 : index
    %3 = vector.load %arg8[%c0, %c0_1] : memref<128x128xf32, #tpu.memory_space<vmem>>, vector<128x128xf32>
    %c0_2 = arith.constant 0 : index
    %c0_3 = arith.constant 0 : index
    %4 = vector.load %arg2[%c0_2, %c0_3] : memref<128x128xbf16, #tpu.memory_space<vmem>>, vector<128x128xbf16>
    %c0_4 = arith.constant 0 : index
    %c0_5 = arith.constant 0 : index
    %5 = vector.load %arg3[%c0_4, %c0_5] : memref<128x128xbf16, #tpu.memory_space<vmem>>, vector<128x128xbf16>
    %cst = arith.constant dense<0.000000e+00> : vector<128x128xf32>
    %6 = tpu.matmul %4, %5, %cst {dimension_numbers = #tpu.dot_dimension_numbers<[1], [0], [0], [1], [0, 0, 1, 1], [], []>} : vector<128x128xbf16>, vector<128x128xbf16>, vector<128x128xf32> -> vector<128x128xf32>
    %7 = arith.addf %3, %6 : vector<128x128xf32>
    %c0_6 = arith.constant 0 : index
    %c0_7 = arith.constant 0 : index
    %8 = vector.load %arg8[%c0_6, %c0_7] : memref<128x128xf32, #tpu.memory_space<vmem>>, vector<128x128xf32>
    tpu.vector_store %arg8[%c0_6, %c0_7], %7 {strides = array<i32>} : memref<128x128xf32, #tpu.memory_space<vmem>>, vector<128x128xf32>,
    %c0_i32_8 = arith.constant 0 : i32
    %9 = arith.cmpi eq, %arg1, %c0_i32_8 : i32
    %10 = arith.extui %9 : i1 to i32
    %c0_i32_9 = arith.constant 0 : i32
    %11 = arith.cmpi ne, %10, %c0_i32_9 : i32
    scf.if %11 {
      %c0_10 = arith.constant 0 : index
      %c0_11 = arith.constant 0 : index
      %12 = vector.load %arg8[%c0_10, %c0_11] : memref<128x128xf32, #tpu.memory_space<vmem>>, vector<128x128xf32>
      %c0_12 = arith.constant 0 : index
      %c0_13 = arith.constant 0 : index
      %13 = vector.load %arg5[%c0_12, %c0_13] : memref<1x128xf32, #tpu.memory_space<vmem>>, vector<1x128xf32>
      %14 = vector.broadcast %13 : vector<1x128xf32> to vector<128x128xf32>
      %15 = arith.addf %12, %14 : vector<128x128xf32>
      %cst_14 = arith.constant 0.000000e+00 : f32
      %16 = vector.broadcast %cst_14 : f32 to vector<128x128xf32>
      %17 = arith.maximumf %15, %16 : vector<128x128xf32>
      %18 = arith.truncf %17 : vector<128x128xf32> to vector<128x128xbf16>
      %c0_15 = arith.constant 0 : index
      %c0_16 = arith.constant 0 : index
      %19 = vector.load %arg6[%c0_15, %c0_16] : memref<128x128xbf16, #tpu.memory_space<vmem>>, vector<128x128xbf16>
      %cst_17 = arith.constant dense<0.000000e+00> : vector<128x128xf32>
      %20 = tpu.matmul %18, %19, %cst_17 {dimension_numbers = #tpu.dot_dimension_numbers<[1], [0], [0], [1], [0, 0, 1, 1], [], []>} : vector<128x128xbf16>, vector<128x128xbf16>, vector<128x128xf32> -> vector<128x128xf32>
      %c0_18 = arith.constant 0 : index
      %c0_19 = arith.constant 0 : index
      %21 = vector.load %arg4[%c0_18, %c0_19] : memref<128x128xf32, #tpu.memory_space<vmem>>, vector<128x128xf32>
      %22 = arith.addf %20, %21 : vector<128x128xf32>
      %cst_20 = arith.constant 0.000000e+00 : f32
      %23 = vector.broadcast %cst_20 : f32 to vector<128x128xf32>
      %24 = arith.maximumf %22, %23 : vector<128x128xf32>
      %c0_21 = arith.constant 0 : index
      %c0_22 = arith.constant 0 : index
      %25 = vector.load %arg7[%c0_21, %c0_22] : memref<128x128xf32, #tpu.memory_space<vmem>>, vector<128x128xf32>
      tpu.vector_store %arg7[%c0_21, %c0_22], %24 {strides = array<i32>} : memref<128x128xf32, #tpu.memory_space<vmem>>, vector<128x128xf32>,
    } else {
    }
    return
  }
  func.func @transform_0(%arg0: i32, %arg1: i32) -> (i32, i32) {
    %c0_i32 = arith.constant 0 : i32
    return %arg0, %arg1 : i32, i32
  }
  func.func @transform_1(%arg0: i32, %arg1: i32) -> (i32, i32) {
    %c0_i32 = arith.constant 0 : i32
    %c0_i32_0 = arith.constant 0 : i32
    return %arg1, %c0_i32 : i32, i32
  }
  func.func @transform_2(%arg0: i32, %arg1: i32) -> (i32, i32) {
    %c0_i32 = arith.constant 0 : i32
    %c0_i32_0 = arith.constant 0 : i32
    return %arg0, %c0_i32 : i32, i32
  }
  func.func @transform_3(%arg0: i32, %arg1: i32) -> (i32, i32) {
    %c0_i32 = arith.constant 0 : i32
    %c0_i32_0 = arith.constant 0 : i32
    %c0_i32_1 = arith.constant 0 : i32
    return %c0_i32, %c0_i32_0 : i32, i32
  }
  func.func @transform_4(%arg0: i32, %arg1: i32) -> (i32, i32) {
    %c0_i32 = arith.constant 0 : i32
    %c0_i32_0 = arith.constant 0 : i32
    %c0_i32_1 = arith.constant 0 : i32
    return %c0_i32, %c0_i32_0 : i32, i32
  }
  func.func @transform_5(%arg0: i32, %arg1: i32) -> (i32, i32) {
    %c0_i32 = arith.constant 0 : i32
    %c0_i32_0 = arith.constant 0 : i32
    return %arg0, %c0_i32 : i32, i32
  }
}

</mosaic_0001>

<bundles_post_ra>
// kernel: residual_block.1
= control target key start
LH: loop header
LB: loop body
LE: loop exit
PB: predicated region body
PF: predicated region fallthrough
CT: control target
= control target key end

     0   :  { %s831_s1 = inlined_call_operand.vmem [shape: bf16[128,128], index: 1, kind: input, shape index: {}]   ;;  %s832_s3 = inlined_call_operand.vmem [shape: f32[1,128], index: 3, kind: input, shape index: {}]   ;;  %s833_s0 = inlined_call_operand.vmem [shape: bf16[128,128], index: 0, kind: input, shape index: {}]   ;;  %s834_s4 = inlined_call_operand.vmem [shape: bf16[128,128], index: 4, kind: input, shape index: {}]   ;;  %s835_s2 = inlined_call_operand.vmem [shape: f32[128,128], index: 2, kind: input, shape index: {}]   ;;  %s836_s5 = inlined_call_operand.vmem [shape: f32[128,128], index: 5, kind: output, shape index: {}]  }
   0x1   :  { %v604_v0 = vld [vmem:[%s831_s1 + $0x38] sm:$0xff]  ;;  %v603_v1 = vld [vmem:[%s831_s1 + $0x30] sm:$0xff]  ;;  %v602_v2 = vld [vmem:[%s831_s1 + $0x28] sm:$0xff] }
   0x2   :  { %184 = vmatpush.bf16.msra.mxu0 %v604_v0  ;;  %613 = vmatpush.bf16.msra.mxu2 %v604_v0  ;;  %v601_v3 = vld [vmem:[%s831_s1 + $0x20] sm:$0xff]  ;;  %v600_v4 = vld [vmem:[%s831_s1 + $0x18] sm:$0xff]  ;;  %v599_v5 = vld [vmem:[%s831_s1 + $0x10] sm:$0xff] }
   0x3   :  { %v598_v6 = vld [vmem:[%s831_s1 + $0x8] sm:$0xff]  ;;  %v597_v7 = vld [vmem:[%s831_s1] sm:$0xff]  ;;  %v612_v12 = vld [vmem:[%s834_s4 + $0x38] sm:$0xff] }
   0x4   :  { %v589_v8 = vld [vmem:[%s833_s0] sm:$0xff]  ;;  %v590_v10 = vld [vmem:[%s833_s0 + $0x8] sm:$0xff]  ;;  %408 = vmatpush.bf16.msra.mxu1 %v612_v12  ;;  %v611_v13 = vld [vmem:[%s834_s4 + $0x30] sm:$0xff]  ;;  %621 = vmatpush.bf16.msra.mxu3 %v612_v12 }
   0x5   :  { %v593_v9 = vld [vmem:[%s833_s0 + $0x20] sm:$0xff]  ;;  %v594_v11 = vld [vmem:[%s833_s0 + $0x28] sm:$0xff]  ;;  %v591_v16 = vld [vmem:[%s833_s0 + $0x10] sm:$0xff] }
   0x6   :  { %185 = vmatpush.bf16.msra.mxu0 %v603_v1  ;;  %614 = vmatpush.bf16.msra.mxu2 %v603_v1  ;;  %v610_v14 = vld [vmem:[%s834_s4 + $0x28] sm:$0xff]  ;;  %v609_v15 = vld [vmem:[%s834_s4 + $0x20] sm:$0xff]  ;;  %v595_v17 = vld [vmem:[%s833_s0 + $0x30] sm:$0xff] }
   0x7   :  { %v592_v18 = vld [vmem:[%s833_s0 + $0x18] sm:$0xff]  ;;  %v607_v21 = vld [vmem:[%s834_s4 + $0x10] sm:$0xff]  ;;  %v606_v22 = vld [vmem:[%s834_s4 + $0x8] sm:$0xff] }
   0x8   :  { %409 = vmatpush.bf16.msra.mxu1 %v611_v13  ;;  %622 = vmatpush.bf16.msra.mxu3 %v611_v13  ;;  %v596_v19 = vld [vmem:[%s833_s0 + $0x38] sm:$0xff]  ;;  %v605_v23 = vld [vmem:[%s834_s4] sm:$0xff] }
   0x9   :  { %v608_v20 = vld [vmem:[%s834_s4 + $0x18] sm:$0xff]  ;;  %v629_v25 = vld [vmem:[%s832_s3] ss:$0 sm:$0xff] }
   0xa   :  { %186 = vmatpush.bf16.msra.mxu0 %v602_v2  ;;  %615 = vmatpush.bf16.msra.mxu2 %v602_v2 }
   0xc   :  { %410 = vmatpush.bf16.msra.mxu1 %v610_v14  ;;  %623 = vmatpush.bf16.msra.mxu3 %v610_v14 }
   0xe   :  { %187 = vmatpush.bf16.msra.mxu0 %v601_v3  ;;  %616 = vmatpush.bf16.msra.mxu2 %v601_v3 }
  0x10   :  { %411 = vmatpush.bf16.msra.mxu1 %v609_v15  ;;  %624 = vmatpush.bf16.msra.mxu3 %v609_v15 }
  0x12   :  { %188 = vmatpush.bf16.msra.mxu0 %v600_v4  ;;  %617 = vmatpush.bf16.msra.mxu2 %v600_v4 }
  0x14   :  { %412 = vmatpush.bf16.msra.mxu1 %v608_v20  ;;  %625 = vmatpush.bf16.msra.mxu3 %v608_v20 }
  0x16   :  { %189 = vmatpush.bf16.msra.mxu0 %v599_v5  ;;  %618 = vmatpush.bf16.msra.mxu2 %v599_v5 }
  0x18   :  { %413 = vmatpush.bf16.msra.mxu1 %v607_v21  ;;  %626 = vmatpush.bf16.msra.mxu3 %v607_v21  ;;  %v345_v21 = vld [vmem:[%s835_s2 + $0x8] sm:$0xff] }
  0x1a   :  { %190 = vmatpush.bf16.msra.mxu0 %v598_v6  ;;  %619 = vmatpush.bf16.msra.mxu2 %v598_v6 }
  0x1c   :  { %414 = vmatpush.bf16.msra.mxu1 %v606_v22  ;;  %627 = vmatpush.bf16.msra.mxu3 %v606_v22 }
  0x1e   :  { %191 = vmatpush.bf16.msra.mxu0 %v597_v7  ;;  %620 = vmatpush.bf16.msra.mxu2 %v597_v7 }
  0x20   :  { %415 = vmatpush.bf16.msra.mxu1 %v605_v23  ;;  %628 = vmatpush.bf16.msra.mxu3 %v605_v23 }
  0x21   :  { %192 = vmatmul.bf16.vlgmr.msra.gmra.mxu0 %v589_v8  ;;  %212 = vmatmul.bf16.vlgmr.msra.gmra.mxu2 %v593_v9 }
  0x31   :  { %197 = vmatmul.bf16.gmra.mxu0 %v590_v10  ;;  %217 = vmatmul.bf16.gmra.mxu2 %v594_v11 }
  0x41   :  { %202 = vmatmul.bf16.gmra.mxu0 %v591_v16  ;;  %222 = vmatmul.bf16.gmra.mxu2 %v595_v17  ;;  %v344_v17 = vld [vmem:[%s835_s2] sm:$0xff] }
  0x51   :  { %207 = vmatmul.bf16.gmra.mxu0 %v592_v18  ;;  %227 = vmatmul.bf16.gmra.mxu2 %v596_v19 }
  0x9e   :  { %v193_v24 = vpop.f32.mrf.mxu0 }
  0x9f   :  { %v288_v26 = vadd.f32 %v629_v25, %v193_v24  ;;  %v352_v24 = vld [vmem:[%s835_s2 + $0x40] sm:$0xff] }
  0xa1   :  { %v304_v29 = vmax.f32 %v288_v26, 0.0 }
  0xa4   :  { %v213_v27 = vpop.f32.mrf.mxu2 }
  0xa5   :  { %v296_v32 = vadd.f32 %v629_v25, %v213_v27 }
  0xa6   :  { %v195_v28 = vpop.f32.mrf.mxu0 }
  0xa7   :  { %v289_v30 = vadd.f32 %v629_v25, %v195_v28  ;;  %v312_v37 = vmax.f32 %v296_v32, 0.0  ;;  %v346_v28 = vld [vmem:[%s835_s2 + $0x10] sm:$0xff]  ;;  %v353_v32 = vld [vmem:[%s835_s2 + $0x48] sm:$0xff] }
  0xa9   :  { %v305_v31 = vmax.f32 %v289_v30, 0.0 }
  0xab   :  { %v320_v33 = vpack.c.bf16 %v305_v31, %v304_v29 }
  0xac   :  { %v215_v34 = vpop.f32.mrf.mxu2 }
  0xad   :  { %v297_v35 = vadd.f32 %v629_v25, %v215_v34  ;;  %416 = vmatmul.bf16.vlgmr.msra.gmra.mxu1 %v320_v33 }
  0xae   :  { %v198_v36 = vpop.f32.mrf.mxu0 }
  0xaf   :  { %v313_v38 = vmax.f32 %v297_v35, 0.0  ;;  %v290_v40 = vadd.f32 %v629_v25, %v198_v36  ;;  %v347_v36 = vld [vmem:[%s835_s2 + $0x18] sm:$0xff] }
  0xb1   :  { %v324_v39 = vpack.c.bf16 %v313_v38, %v312_v37  ;;  %v306_v43 = vmax.f32 %v290_v40, 0.0  ;;  %v354_v40 = vld [vmem:[%s835_s2 + $0x50] sm:$0xff] }
  0xb3   :  { %436 = vmatmul.bf16.vlgmr.msra.gmra.mxu3 %v324_v39 }
  0xb4   :  { %v218_v41 = vpop.f32.mrf.mxu2 }
  0xb5   :  { %v298_v46 = vadd.f32 %v629_v25, %v218_v41 }
  0xb6   :  { %v200_v42 = vpop.f32.mrf.mxu0 }
  0xb7   :  { %v291_v44 = vadd.f32 %v629_v25, %v200_v42  ;;  %v314_v51 = vmax.f32 %v298_v46, 0.0 }
  0xb9   :  { %v307_v45 = vmax.f32 %v291_v44, 0.0  ;;  %v348_v44 = vld [vmem:[%s835_s2 + $0x20] sm:$0xff] }
  0xbb   :  { %v321_v47 = vpack.c.bf16 %v307_v45, %v306_v43 }
  0xbc   :  { %v220_v48 = vpop.f32.mrf.mxu2 }
  0xbd   :  { %v299_v49 = vadd.f32 %v629_v25, %v220_v48  ;;  %421 = vmatmul.bf16.gmra.mxu1 %v321_v47  ;;  %v355_v48 = vld [vmem:[%s835_s2 + $0x58] sm:$0xff] }
  0xbe   :  { %v203_v50 = vpop.f32.mrf.mxu0 }
  0xbf   :  { %v315_v52 = vmax.f32 %v299_v49, 0.0  ;;  %v292_v54 = vadd.f32 %v629_v25, %v203_v50 }
  0xc1   :  { %v325_v53 = vpack.c.bf16 %v315_v52, %v314_v51  ;;  %v308_v57 = vmax.f32 %v292_v54, 0.0  ;;  %v349_v52 = vld [vmem:[%s835_s2 + $0x28] sm:$0xff] }
  0xc3   :  { %441 = vmatmul.bf16.gmra.mxu3 %v325_v53 }
  0xc4   :  { %v223_v55 = vpop.f32.mrf.mxu2 }
  0xc5   :  { %v300_v60 = vadd.f32 %v629_v25, %v223_v55 }
  0xc6   :  { %v205_v56 = vpop.f32.mrf.mxu0 }
  0xc7   :  { %v293_v58 = vadd.f32 %v629_v25, %v205_v56  ;;  %v316_v1 = vmax.f32 %v300_v60, 0.0  ;;  %v356_v56 = vld [vmem:[%s835_s2 + $0x60] sm:$0xff]  ;;  %v350_v60 = vld [vmem:[%s835_s2 + $0x30] sm:$0xff] }
  0xc9   :  { %v309_v59 = vmax.f32 %v293_v58, 0.0 }
  0xcb   :  { %v322_v61 = vpack.c.bf16 %v309_v59, %v308_v57 }
  0xcc   :  { %v225_v62 = vpop.f32.mrf.mxu2 }
  0xcd   :  { %v301_v63 = vadd.f32 %v629_v25, %v225_v62  ;;  %426 = vmatmul.bf16.gmra.mxu1 %v322_v61 }
  0xce   :  { %v208_v0 = vpop.f32.mrf.mxu0 }
  0xcf   :  { %v317_v2 = vmax.f32 %v301_v63, 0.0  ;;  %v294_v4 = vadd.f32 %v629_v25, %v208_v0  ;;  %v357_v0 = vld [vmem:[%s835_s2 + $0x68] sm:$0xff] }
  0xd1   :  { %v326_v3 = vpack.c.bf16 %v317_v2, %v316_v1  ;;  %v310_v7 = vmax.f32 %v294_v4, 0.0  ;;  %v351_v4 = vld [vmem:[%s835_s2 + $0x38] sm:$0xff] }
  0xd3   :  { %446 = vmatmul.bf16.gmra.mxu3 %v326_v3 }
  0xd4   :  { %v228_v5 = vpop.f32.mrf.mxu2 }
  0xd5   :  { %v302_v10 = vadd.f32 %v629_v25, %v228_v5 }
  0xd6   :  { %v210_v6 = vpop.f32.mrf.mxu0 }
  0xd7   :  { %v295_v8 = vadd.f32 %v629_v25, %v210_v6  ;;  %v318_v14 = vmax.f32 %v302_v10, 0.0 }
  0xd9   :  { %v311_v9 = vmax.f32 %v295_v8, 0.0  ;;  %v358_v8 = vld [vmem:[%s835_s2 + $0x70] sm:$0xff] }
  0xdb   :  { %v323_v11 = vpack.c.bf16 %v311_v9, %v310_v7 }
  0xdc   :  { %v230_v12 = vpop.f32.mrf.mxu2 }
  0xdd   :  { %v303_v13 = vadd.f32 %v629_v25, %v230_v12  ;;  %431 = vmatmul.bf16.gmra.mxu1 %v323_v11 }
  0xdf   :  { %v319_v15 = vmax.f32 %v303_v13, 0.0  ;;  %v359_v13 = vld [vmem:[%s835_s2 + $0x78] sm:$0xff] }
  0xe1   :  { %v327_v16 = vpack.c.bf16 %v319_v15, %v318_v14 }
  0xe3   :  { %451 = vmatmul.bf16.gmra.mxu3 %v327_v16 }
 0x12a   :  { %v417_v18 = vpop.f32.mrf.mxu1 }
 0x12b   :  { %v418_v19 = vadd.f32 %v417_v18, %v344_v17 }
 0x12d   :  { %v457_v20 = vmax.f32 %v418_v19, 0.0 }
 0x12f   :  { %473 = vst [vmem:[%s836_s5] sm:$0xff] %v457_v20 }
 0x132   :  { %v419_v22 = vpop.f32.mrf.mxu1 }
 0x133   :  { %v420_v23 = vadd.f32 %v419_v22, %v345_v21 }
 0x135   :  { %v458_v25 = vmax.f32 %v420_v23, 0.0 }
 0x136   :  { %v437_v26 = vpop.f32.mrf.mxu3 }
 0x137   :  { %474 = vst [vmem:[%s836_s5 + $0x8] sm:$0xff] %v458_v25  ;;  %v438_v27 = vadd.f32 %v437_v26, %v352_v24 }
 0x139   :  { %v465_v29 = vmax.f32 %v438_v27, 0.0 }
 0x13a   :  { %v422_v30 = vpop.f32.mrf.mxu1 }
 0x13b   :  { %481 = vst [vmem:[%s836_s5 + $0x40] sm:$0xff] %v465_v29  ;;  %v423_v31 = vadd.f32 %v422_v30, %v346_v28 }
 0x13d   :  { %v459_v33 = vmax.f32 %v423_v31, 0.0 }
 0x13e   :  { %v439_v34 = vpop.f32.mrf.mxu3 }
 0x13f   :  { %475 = vst [vmem:[%s836_s5 + $0x10] sm:$0xff] %v459_v33  ;;  %v440_v35 = vadd.f32 %v439_v34, %v353_v32 }
 0x141   :  { %v466_v37 = vmax.f32 %v440_v35, 0.0 }
 0x142   :  { %v424_v38 = vpop.f32.mrf.mxu1 }
 0x143   :  { %482 = vst [vmem:[%s836_s5 + $0x48] sm:$0xff] %v466_v37  ;;  %v425_v39 = vadd.f32 %v424_v38, %v347_v36 }
 0x145   :  { %v460_v41 = vmax.f32 %v425_v39, 0.0 }
 0x146   :  { %v442_v42 = vpop.f32.mrf.mxu3 }
 0x147   :  { %476 = vst [vmem:[%s836_s5 + $0x18] sm:$0xff] %v460_v41  ;;  %v443_v43 = vadd.f32 %v442_v42, %v354_v40 }
 0x149   :  { %v467_v45 = vmax.f32 %v443_v43, 0.0 }
 0x14a   :  { %v427_v46 = vpop.f32.mrf.mxu1 }
 0x14b   :  { %483 = vst [vmem:[%s836_s5 + $0x50] sm:$0xff] %v467_v45  ;;  %v428_v47 = vadd.f32 %v427_v46, %v348_v44 }
 0x14d   :  { %v461_v49 = vmax.f32 %v428_v47, 0.0 }
 0x14e   :  { %v444_v50 = vpop.f32.mrf.mxu3 }
 0x14f   :  { %477 = vst [vmem:[%s836_s5 + $0x20] sm:$0xff] %v461_v49  ;;  %v445_v51 = vadd.f32 %v444_v50, %v355_v48 }
 0x151   :  { %v468_v53 = vmax.f32 %v445_v51, 0.0 }
 0x152   :  { %v429_v54 = vpop.f32.mrf.mxu1 }
 0x153   :  { %484 = vst [vmem:[%s836_s5 + $0x58] sm:$0xff] %v468_v53  ;;  %v430_v55 = vadd.f32 %v429_v54, %v349_v52 }
 0x155   :  { %v462_v57 = vmax.f32 %v430_v55, 0.0 }
 0x156   :  { %v447_v58 = vpop.f32.mrf.mxu3 }
 0x157   :  { %478 = vst [vmem:[%s836_s5 + $0x28] sm:$0xff] %v462_v57  ;;  %v448_v59 = vadd.f32 %v447_v58, %v356_v56 }
 0x159   :  { %v469_v61 = vmax.f32 %v448_v59, 0.0 }
 0x15a   :  { %v432_v62 = vpop.f32.mrf.mxu1 }
 0x15b   :  { %485 = vst [vmem:[%s836_s5 + $0x60] sm:$0xff] %v469_v61  ;;  %v433_v63 = vadd.f32 %v432_v62, %v350_v60 }
 0x15d   :  { %v463_v1 = vmax.f32 %v433_v63, 0.0 }
 0x15e   :  { %v449_v2 = vpop.f32.mrf.mxu3 }
 0x15f   :  { %479 = vst [vmem:[%s836_s5 + $0x30] sm:$0xff] %v463_v1  ;;  %v450_v3 = vadd.f32 %v449_v2, %v357_v0 }
 0x161   :  { %v470_v5 = vmax.f32 %v450_v3, 0.0 }
 0x162   :  { %v434_v6 = vpop.f32.mrf.mxu1 }
 0x163   :  { %486 = vst [vmem:[%s836_s5 + $0x68] sm:$0xff] %v470_v5  ;;  %v435_v7 = vadd.f32 %v434_v6, %v351_v4 }
 0x165   :  { %v464_v9 = vmax.f32 %v435_v7, 0.0 }
 0x166   :  { %v452_v10 = vpop.f32.mrf.mxu3 }
 0x167   :  { %480 = vst [vmem:[%s836_s5 + $0x38] sm:$0xff] %v464_v9  ;;  %v453_v11 = vadd.f32 %v452_v10, %v358_v8 }
 0x169   :  { %v471_v12 = vmax.f32 %v453_v11, 0.0 }
 0x16b   :  { %487 = vst [vmem:[%s836_s5 + $0x70] sm:$0xff] %v471_v12 }
 0x16e   :  { %v454_v14 = vpop.f32.mrf.mxu3 }
 0x16f   :  { %v455_v15 = vadd.f32 %v454_v14, %v359_v13 }
 0x171   :  { %v472_v16 = vmax.f32 %v455_v15, 0.0 }
 0x173   :  { %488 = vst [vmem:[%s836_s5 + $0x78] sm:$0xff] %v472_v16 }

</bundles_post_ra>
